<compile_context>
chip_gen: v7x
topology: tpu7x:2x2x1
jax: 0.10.0
libtpu: 0.0.40
codegen_flags: <defaults>
</compile_context>

<pallas_src>
import numpy as np
import jax
import jax.numpy as jnp
from jax import lax
from jax.experimental import pallas as pl
from jax.experimental.pallas import tpu as pltpu

# ----------------------------- config ---------------------------------------
N_MELS = 16
SR = 16000
WIN_LENGTH = 128
HOP_LENGTH = 32
N_FFT = WIN_LENGTH          # module default: n_fft = win_length
MEL_FMIN = 0.0
MEL_FMAX = None             # -> sr / 2
CLAMP = 1e-5

N_FREQ = N_FFT // 2 + 1     # 65 (onesided)
F_PAD = 128                 # padded frequency axis for lane alignment
M_TILE_DEFAULT = 512        # frames (rows) per grid step


# ------------------------- parameter construction (host) --------------------
def _hz_to_mel_htk(f):
    return 2595.0 * np.log10(1.0 + np.asarray(f, dtype=np.float64) / 700.0)


def _mel_to_hz_htk(m):
    return 700.0 * (10.0 ** (np.asarray(m, dtype=np.float64) / 2595.0) - 1.0)


def make_mel_basis(sr, n_fft, n_mels, fmin, fmax):
    """librosa.filters.mel(htk=True, norm='slaney') reimplementation."""
    if fmax is None:
        fmax = sr / 2.0
    fftfreqs = np.linspace(0.0, sr / 2.0, n_fft // 2 + 1)
    mel_min, mel_max = _hz_to_mel_htk(fmin), _hz_to_mel_htk(fmax)
    mel_pts = np.linspace(mel_min, mel_max, n_mels + 2)
    mel_f = _mel_to_hz_htk(mel_pts)                       # (n_mels + 2,) Hz

    fdiff = np.diff(mel_f)                                # (n_mels + 1,)
    ramps = mel_f[:, None] - fftfreqs[None, :]            # (n_mels + 2, n_freq)

    lower = -ramps[:-2] / fdiff[:-1, None]
    upper = ramps[2:] / fdiff[1:, None]
    weights = np.maximum(0.0, np.minimum(lower, upper))

    enorm = 2.0 / (mel_f[2:n_mels + 2] - mel_f[:n_mels])  # slaney norm
    weights *= enorm[:, None]
    return weights.astype(np.float32)                     # (n_mels, n_freq)


def make_dft_basis(n_fft, n_freq):
    """Onesided real-input DFT basis: X[f] = sum_n x[n] * exp(-2*pi*i*f*n/N)."""
    n = np.arange(n_fft)[:, None].astype(np.float64)
    f = np.arange(n_freq)[None, :].astype(np.float64)
    ang = 2.0 * np.pi * n * f / n_fft
    cos_b = np.cos(ang).astype(np.float32)                # (n_fft, n_freq)
    sin_b = (-np.sin(ang)).astype(np.float32)             # (n_fft, n_freq)
    return cos_b, sin_b


def hann_window_periodic(win_length):
    n = np.arange(win_length, dtype=np.float64)
    return (0.5 - 0.5 * np.cos(2.0 * np.pi * n / win_length)).astype(np.float32)


# Module-level constants: built once (numpy), converted once (device).
_WINDOW = hann_window_periodic(WIN_LENGTH)                      # (n_fft,)
_COS, _SIN = make_dft_basis(N_FFT, N_FREQ)                      # (n_fft, n_freq)
_MEL = make_mel_basis(SR, N_FFT, N_MELS, MEL_FMIN, MEL_FMAX)    # (n_mels, n_freq)

# Fused windowed DFT basis: (x*w) @ C == x @ (w*C). cos || sin -> 256 lanes,
# one MXU weight push per frame tile instead of two.
_basis_np = np.zeros((N_FFT, 2 * F_PAD), np.float32)
_basis_np[:, :N_FREQ] = _WINDOW[:, None] * _COS
_basis_np[:, F_PAD:F_PAD + N_FREQ] = _WINDOW[:, None] * _SIN
BASIS = jnp.asarray(_basis_np)                                  # (128, 256)

# Mel basis, frequency axis zero-padded to 128 lanes (padded freqs carry zero
# DFT basis so they contribute nothing).
_mel16_np = np.zeros((N_MELS, F_PAD), np.float32)
_mel16_np[:, :N_FREQ] = _MEL
MEL16 = jnp.asarray(_mel16_np)                                  # (16, 128)


# ------------------------------ Pallas kernel --------------------------------
def mel_spec_kernel(rows_ref, halo_ref, basis_ref, mel_ref, out_ref):
    # rows_ref: (m_tile, 32) hop rows, halo_ref: (8, 32) rows from the next
    # tile.  Frame j = hop rows j, j+1, j+2, j+3 concatenated on the lane axis.
    combined = jnp.concatenate([rows_ref[...], halo_ref[...]], axis=0)
    frames = jnp.concatenate(
        [combined[:-8], combined[1:-7], combined[2:-6], combined[3:-5]],
        axis=1)                                           # (m_tile, 128)

    # One MXU pass for cos + sin halves (window folded into the basis).
    y = jnp.dot(frames, basis_ref[...],
                preferred_element_type=jnp.float32)       # (m_tile, 256)
    real = y[:, :F_PAD]
    imag = y[:, F_PAD:]
    mag = jnp.sqrt(real * real + imag * imag)             # (m_tile, 128)

    # Mel projection contracting the frequency (lane) axis of mag directly:
    # output is (n_mels=16, m_tile) — sublanes x lanes, the torch layout.
    mel = lax.dot_general(mel_ref[...], mag,
                          dimension_numbers=(((1,), (1,)), ((), ())),
                          preferred_element_type=jnp.float32)   # (16, m_tile)
    out_ref[...] = jnp.log(jnp.maximum(mel, CLAMP))


def mel_spectrogram(audio, m_tile=M_TILE_DEFAULT):
    """audio: (B, L) float32 -> log-mel (B, n_mels, T) float32."""
    B, L = audio.shape
    pad = N_FFT // 2
    # center=True: reflect-pad both sides (torch.stft default pad_mode='reflect')
    padded = jnp.pad(audio, ((0, 0), (pad, pad)), mode="reflect")
    T = 1 + L // HOP_LENGTH                               # number of frames

    # Non-overlapping 32-sample hop rows (1x the audio — no 4x frame gather).
    n_rows = T + 3                                        # rows a frame can touch
    padded = padded[:, :n_rows * HOP_LENGTH]
    rows = padded.reshape(B, n_rows, HOP_LENGTH).astype(jnp.float32)

    # Tile of frames per grid step: multiple of 128 (lane-dense output),
    # clamped so tiny inputs don't allocate a huge padded tile.
    m_tile = min(m_tile, ((T + 127) // 128) * 128)
    num_tiles = pl.cdiv(T, m_tile)
    t_padded = num_tiles * m_tile
    rows_needed = t_padded + 8                            # +8-row halo for last tile
    if rows_needed > n_rows:
        rows = jnp.pad(rows, ((0, 0), (0, rows_needed - n_rows), (0, 0)))

    halo_blk = m_tile // 8                                # halo block index stride

    out = pl.pallas_call(
        mel_spec_kernel,
        out_shape=jax.ShapeDtypeStruct((B, N_MELS, t_padded), jnp.float32),
        grid_spec=pltpu.PrefetchScalarGridSpec(
            num_scalar_prefetch=0,
            grid=(B, num_tiles),
            in_specs=[
                # main hop rows of this tile
                pl.BlockSpec((None, m_tile, HOP_LENGTH),
                             lambda b, i: (b, i, 0)),
                # 8-row halo: first rows of the *next* tile (same array)
                pl.BlockSpec((None, 8, HOP_LENGTH),
                             lambda b, i: (b, (i + 1) * halo_blk, 0)),
                # constants: constant index_map -> DMA'd once, reused
                pl.BlockSpec((N_FFT, 2 * F_PAD), lambda b, i: (0, 0)),
                pl.BlockSpec((N_MELS, F_PAD), lambda b, i: (0, 0)),
            ],
            out_specs=pl.BlockSpec((None, N_MELS, m_tile),
                                   lambda b, i: (b, 0, i)),
        ),
        compiler_params=pltpu.CompilerParams(
            dimension_semantics=("parallel", "parallel")),
    )(rows, rows, BASIS, MEL16)

    return out[:, :, :T]                                  # (B, n_mels, T)


# ----------------------------- reference (plain JAX) --------------------------
def mel_spectrogram_ref(audio):
    B, L = audio.shape
    pad = N_FFT // 2
    padded = jnp.pad(audio, ((0, 0), (pad, pad)), mode="reflect")
    T = 1 + (padded.shape[1] - N_FFT) // HOP_LENGTH
    idx = HOP_LENGTH * jnp.arange(T)[:, None] + jnp.arange(N_FFT)[None, :]
    frames = padded[:, idx] * jnp.asarray(_WINDOW)
    real = frames @ jnp.asarray(_COS)
    imag = frames @ jnp.asarray(_SIN)
    mag = jnp.sqrt(real * real + imag * imag)             # (B, T, n_freq)
    mel = jnp.einsum("mf,btf->bmt", jnp.asarray(_MEL), mag)
    return jnp.log(jnp.maximum(mel, CLAMP))


# ------------------------------------ main ------------------------------------
if __name__ == "__main__":
    key = jax.random.PRNGKey(0)
    B, L = 2, 2016                                        # -> 64 STFT frames
    audio = jax.random.normal(key, (B, L), dtype=jnp.float32)

    out = jax.block_until_ready(mel_spectrogram(audio))
    ref = jax.block_until_ready(mel_spectrogram_ref(audio))
    assert out.shape == (B, N_MELS, 1 + L // HOP_LENGTH), out.shape
    np.testing.assert_allclose(np.asarray(out), np.asarray(ref),
                               rtol=1e-4, atol=1e-4)

    # Multi-tile case: exercises the 8-row halo across a tile boundary and a
    # partially-filled last tile.
    audio2 = jax.random.normal(jax.random.PRNGKey(0), (1, 4800),
                               dtype=jnp.float32)         # -> 151 frames
    out2 = jax.block_until_ready(mel_spectrogram(audio2, m_tile=128))
    ref2 = jax.block_until_ready(mel_spectrogram_ref(audio2))
    assert out2.shape == (1, N_MELS, 151), out2.shape
    np.testing.assert_allclose(np.asarray(out2), np.asarray(ref2),
                               rtol=1e-4, atol=1e-4)

    print("KERNEL_OK")
</pallas_src>

<mosaic_0001>
module attributes {stable_mosaic.version = 11 : i64} {
  func.func @mel_spec_kernel(%arg0: i32, %arg1: i32, %arg2: memref<1x128x32xf32, #tpu.memory_space<vmem>>, %arg3: memref<1x8x32xf32, #tpu.memory_space<vmem>>, %arg4: memref<128x256xf32, #tpu.memory_space<vmem>>, %arg5: memref<16x128xf32, #tpu.memory_space<vmem>>, %arg6: memref<1x16x128xf32, #tpu.memory_space<vmem>>) attributes {dimension_semantics = [#tpu.dimension_semantics<parallel>, #tpu.dimension_semantics<parallel>], iteration_bounds = array<i64: 2, 1>, scalar_prefetch = 0 : i64, scratch_operands = 0 : i64, tpu.core_type = #tpu.core_type<tc>, window_params = [{transform_indices = @transform_0, window_bounds = array<i64: 1, 128, 32>}, {transform_indices = @transform_1, window_bounds = array<i64: 1, 8, 32>}, {pipeline_mode = #tpu.pipeline_mode<synchronous>, transform_indices = @transform_2, window_bounds = array<i64: 128, 256>}, {pipeline_mode = #tpu.pipeline_mode<synchronous>, transform_indices = @transform_3, window_bounds = array<i64: 16, 128>}, {transform_indices = @transform_4, window_bounds = array<i64: 1, 16, 128>}]} {
    %c0 = arith.constant 0 : index
    %c0_0 = arith.constant 0 : index
    %c0_1 = arith.constant 0 : index
    %0 = vector.load %arg2[%c0, %c0_0, %c0_1] : memref<1x128x32xf32, #tpu.memory_space<vmem>>, vector<1x128x32xf32>
    %1 = vector.shape_cast %0 : vector<1x128x32xf32> to vector<128x32xf32>
    %c0_2 = arith.constant 0 : index
    %c0_3 = arith.constant 0 : index
    %c0_4 = arith.constant 0 : index
    %2 = vector.load %arg3[%c0_2, %c0_3, %c0_4] : memref<1x8x32xf32, #tpu.memory_space<vmem>>, vector<1x8x32xf32>
    %3 = vector.shape_cast %2 : vector<1x8x32xf32> to vector<8x32xf32>
    %4 = tpu.concatenate %1, %3 in 0 : vector<128x32xf32>, vector<8x32xf32> -> vector<136x32xf32>
    %5 = vector.extract_strided_slice %4 {offsets = [0, 0], sizes = [128, 32], strides = [1, 1]} : vector<136x32xf32> to vector<128x32xf32>
    %6 = vector.extract_strided_slice %4 {offsets = [1, 0], sizes = [128, 32], strides = [1, 1]} : vector<136x32xf32> to vector<128x32xf32>
    %7 = vector.extract_strided_slice %4 {offsets = [2, 0], sizes = [128, 32], strides = [1, 1]} : vector<136x32xf32> to vector<128x32xf32>
    %8 = vector.extract_strided_slice %4 {offsets = [3, 0], sizes = [128, 32], strides = [1, 1]} : vector<136x32xf32> to vector<128x32xf32>
    %9 = tpu.concatenate %5, %6, %7, %8 in 1 : vector<128x32xf32>, vector<128x32xf32>, vector<128x32xf32>, vector<128x32xf32> -> vector<128x128xf32>
    %c0_5 = arith.constant 0 : index
    %c0_6 = arith.constant 0 : index
    %10 = vector.load %arg4[%c0_5, %c0_6] : memref<128x256xf32, #tpu.memory_space<vmem>>, vector<128x256xf32>
    %cst = arith.constant dense<0.000000e+00> : vector<128x256xf32>
    %11 = tpu.matmul %9, %10, %cst {dimension_numbers = #tpu.dot_dimension_numbers<[1], [0], [0], [1], [0, 0, 1, 1], [], []>} : vector<128x128xf32>, vector<128x256xf32>, vector<128x256xf32> -> vector<128x256xf32>
    %12 = vector.extract_strided_slice %11 {offsets = [0, 0], sizes = [128, 128], strides = [1, 1]} : vector<128x256xf32> to vector<128x128xf32>
    %13 = vector.extract_strided_slice %11 {offsets = [0, 128], sizes = [128, 128], strides = [1, 1]} : vector<128x256xf32> to vector<128x128xf32>
    %14 = arith.mulf %12, %12 : vector<128x128xf32>
    %15 = arith.mulf %13, %13 : vector<128x128xf32>
    %16 = arith.addf %14, %15 : vector<128x128xf32>
    %17 = math.sqrt %16 : vector<128x128xf32>
    %c0_7 = arith.constant 0 : index
    %c0_8 = arith.constant 0 : index
    %18 = vector.load %arg5[%c0_7, %c0_8] : memref<16x128xf32, #tpu.memory_space<vmem>>, vector<16x128xf32>
    %cst_9 = arith.constant dense<0.000000e+00> : vector<16x128xf32>
    %19 = tpu.matmul %18, %17, %cst_9 {dimension_numbers = #tpu.dot_dimension_numbers<[1], [1], [0], [0], [0, 0, 1, 0], [], []>} : vector<16x128xf32>, vector<128x128xf32>, vector<16x128xf32> -> vector<16x128xf32>
    %cst_10 = arith.constant 9.99999974E-6 : f32
    %20 = vector.broadcast %cst_10 : f32 to vector<16x128xf32>
    %21 = arith.maximumf %19, %20 : vector<16x128xf32>
    %22 = math.log %21 : vector<16x128xf32>
    %c0_11 = arith.constant 0 : index
    %c0_12 = arith.constant 0 : index
    %c0_13 = arith.constant 0 : index
    %23 = vector.load %arg6[%c0_11, %c0_12, %c0_13] : memref<1x16x128xf32, #tpu.memory_space<vmem>>, vector<1x16x128xf32>
    %24 = vector.shape_cast %23 : vector<1x16x128xf32> to vector<16x128xf32>
    %25 = vector.shape_cast %22 : vector<16x128xf32> to vector<1x16x128xf32>
    tpu.vector_store %arg6[%c0_11, %c0_12, %c0_13], %25 {strides = array<i32>} : memref<1x16x128xf32, #tpu.memory_space<vmem>>, vector<1x16x128xf32>,
    return
  }
  func.func @transform_0(%arg0: i32, %arg1: i32) -> (i32, i32, i32) {
    %c0_i32 = arith.constant 0 : i32
    %c0_i32_0 = arith.constant 0 : i32
    return %arg0, %arg1, %c0_i32 : i32, i32, i32
  }
  func.func @transform_1(%arg0: i32, %arg1: i32) -> (i32, i32, i32) {
    %c1_i32 = arith.constant 1 : i32
    %0 = arith.addi %arg1, %c1_i32 : i32
    %c16_i32 = arith.constant 16 : i32
    %1 = arith.muli %0, %c16_i32 : i32
    %c0_i32 = arith.constant 0 : i32
    %c0_i32_0 = arith.constant 0 : i32
    return %arg0, %1, %c0_i32 : i32, i32, i32
  }
  func.func @transform_2(%arg0: i32, %arg1: i32) -> (i32, i32) {
    %c0_i32 = arith.constant 0 : i32
    %c0_i32_0 = arith.constant 0 : i32
    %c0_i32_1 = arith.constant 0 : i32
    return %c0_i32, %c0_i32_0 : i32, i32
  }
  func.func @transform_3(%arg0: i32, %arg1: i32) -> (i32, i32) {
    %c0_i32 = arith.constant 0 : i32
    %c0_i32_0 = arith.constant 0 : i32
    %c0_i32_1 = arith.constant 0 : i32
    return %c0_i32, %c0_i32_0 : i32, i32
  }
  func.func @transform_4(%arg0: i32, %arg1: i32) -> (i32, i32, i32) {
    %c0_i32 = arith.constant 0 : i32
    %c0_i32_0 = arith.constant 0 : i32
    return %arg0, %c0_i32, %arg1 : i32, i32, i32
  }
}

</mosaic_0001>

<bundles_post_ra>
// kernel: tpu_custom_call.1
= control target key start
LH: loop header
LB: loop body
LE: loop exit
PB: predicated region body
PF: predicated region fallthrough
CT: control target
= control target key end

     0   :  { %9 = vsyncpa [#allocation3], 0  ;;  %s2185_s0 = inlined_call_operand.vmem [shape: f32[2,136,32], index: 0, kind: input, shape index: {}]   ;;  %s2186_s1 = inlined_call_operand.vmem [shape: f32[2,136,32], index: 1, kind: input, shape index: {}]   ;;  %s2187_s2 = inlined_call_operand.vmem [shape: f32[128,256], index: 2, kind: input, shape index: {}]   ;;  %s2188_s3 = inlined_call_operand.vmem [shape: f32[16,128], index: 3, kind: input, shape index: {}]   ;;  %s2189_s4 = inlined_call_operand.hbm [shape: f32[2,16,128], index: 4, kind: output, shape index: {}]  }
   0x1   :  { %11 = vsyncpa [#allocation3 + $0x1], 0  ;;  %s1621_s15 = smov 0   ;;  %s1623_s16 = smov 0  }
   0x2   :  { %s1625_s17 = smov 0   ;;  %s1627_s18 = smov 0  }
   0x3   :  { %s1629_s19 = smov 0   ;;  %s1631_s20 = smov 0  }
   0x4 LB: > { %s1171_s21 = sadd.s32 4294967295, %s1587_s20   ;;  %s1172_s22 = sadd.s32 4294967294, %s1587_s20   ;;  %s1587_s20 = sphi %s1631_s20, %s17_s20   ;;  %s1583_s19 = sphi %s1629_s19, %s2196_s19   ;;  %s1579_s18 = sphi %s1627_s18, %s2195_s18   ;;  %s1575_s17 = sphi %s1625_s17, %s2194_s17   ;;  %s1571_s16 = sphi %s1623_s16, %s2193_s16   ;;  %s1567_s15 = sphi %s1621_s15, %s2192_s15  }
   0x5   : > { %s29_s23 = sadd.s32 1, %s1583_s19  ;;  %s140_s24 = sadd.s32 1, %s1575_s17 }
   0x6   : > { %p31_p0 = scmp.ge.s32.totalorder %s29_s23, 2  ;;  %p150_p1 = scmp.ne.s32.totalorder %s1575_s17, %s1571_s16 }
   0x7   : > { %p151_p2 = scmp.eq.s32.totalorder %s1171_s21, 1  ;;  %p156_p3 = scmp.ne.s32.totalorder %s1571_s16, %s1567_s15 }
   0x8   : > { %s2198_s23 = smov (%p31_p0, %s29_s23), 0  ;;  %p157_p5 = scmp.eq.s32.totalorder %s1172_s22, 1 }
   0x9   : > { %p1661_p4 = por %p151_p2, %p150_p1  ;;  %s135_s26 = ssub.s32 %s1583_s19, %s2198_s23 }
   0xa   : > { %p1175_p6 = scmp.ge.s32.totalorder %s1587_s20, 1  ;;  %p138_p7 = scmp.eq.s32.totalorder %s135_s26, 0 }
   0xb   : > { %p1668_p8 = por %p157_p5, %p156_p3  ;;  %p217_p9 = scmp.lt.s32.totalorder %s1587_s20, 3 }
   0xc   : > { %s1674_s28 = scalar_select %p138_p7, %s1575_s17, %s140_s24  }
   0xd   : > { %p218_p10 = pnand %p1175_p6, %p217_p9 }
   0xe   : > { %p266_p11 = scmp.lt.s32.totalorder (!%p218_p10), %s1579_s18, 1  ;;  %v623_v0 = vld [vmem:[%s2187_s2 + $0x8] sm:$0xff] (!%p218_p10)  ;;  %v625_v1 = vld [vmem:[%s2187_s2 + $0x18] sm:$0xff] (!%p218_p10)  ;;  %v622_v2 = vld [vmem:[%s2187_s2] sm:$0xff] (!%p218_p10)  ;;  %vm325_vm0 = vcmask (!%p218_p10), 1046528   ;;  %vm489_vm1 = vcmask (!%p218_p10), 1044480  }
   0xf   : > { %221 = sbr.rel (%p218_p10) target bundleno = 701 (0x2bd), region = 36  ;;  %v624_v3 = vld [vmem:[%s2187_s2 + $0x10] sm:$0xff] (!%p218_p10)  ;;  %v1240_v4 = vpack.c.bf16 (!%p218_p10), %v625_v1, %v623_v0  ;;  %v627_v6 = vld [vmem:[%s2187_s2 + $0x28] sm:$0xff] (!%p218_p10)  ;;  %v629_v7 = vld [vmem:[%s2187_s2 + $0x38] sm:$0xff] (!%p218_p10)  ;;  %vm407_vm2 = vcmask (!%p218_p10), 1045504   ;;  %v1589_v23 = vmov (!%p218_p10), 0.0  }
  0x10   : > { %v1242_v5 = vpack.c.bf16 (!%p218_p10), %v624_v3, %v622_v2  ;;  %v626_v8 = vld [vmem:[%s2187_s2 + $0x20] sm:$0xff] (!%p218_p10)  ;;  %v1244_v9 = vpack.c.bf16 (!%p218_p10), %v629_v7, %v627_v6  ;;  %v628_v10 = vld [vmem:[%s2187_s2 + $0x30] sm:$0xff] (!%p218_p10)  ;;  %v631_v11 = vld [vmem:[%s2187_s2 + $0x48] sm:$0xff] (!%p218_p10)  ;;  %718 = vmatprep.mubr.f32.mxu0 (!%p218_p10), %v1589_v23  ;;  %s1590_s21 = smov (!%p218_p10), 32   ;;  %s1591_s22 = smov (!%p218_p10), 96   ;;  %vm571_vm3 = vcmask (!%p218_p10), 261120  }
  0x11   : > { %v633_v12 = vld [vmem:[%s2187_s2 + $0x58] sm:$0xff] (!%p218_p10)  ;;  %1241 = vmatprep.subr.bf16.mxu0 (!%p218_p10), %v1240_v4  ;;  %v630_v13 = vld [vmem:[%s2187_s2 + $0x40] sm:$0xff] (!%p218_p10)  ;;  %v632_v14 = vld [vmem:[%s2187_s2 + $0x50] sm:$0xff] (!%p218_p10)  ;;  %v1246_v16 = vpack.c.bf16 (!%p218_p10), %v628_v10, %v626_v8  ;;  %s1592_s24 = smov (!%p218_p10), 64   ;;  %vm588_vm4 = vcmask (!%p218_p10), 523264   ;;  %vm605_vm5 = vcmask (!%p218_p10), 785408  }
  0x12   : > { %v635_v15 = vld [vmem:[%s2187_s2 + $0x68] sm:$0xff] (!%p218_p10)  ;;  %1243 = vmatpush1.bf16.msra.mxu0 (!%p218_p10), %v1242_v5  ;;  %v637_v17 = vld [vmem:[%s2187_s2 + $0x78] sm:$0xff] (!%p218_p10)  ;;  %v1726_v18 = vld [vmem:[%s2187_s2 + $0x60] sm:$0xff] (!%p218_p10)  ;;  %v1248_v20 = vpack.c.bf16 (!%p218_p10), %v633_v12, %v631_v11  ;;  %v1250_v27 = vpack.c.bf16 (!%p218_p10), %v632_v14, %v630_v13  ;;  %s1186_s6 = sshll.u32 (!%p218_p10), %s1579_s18, 8 }
  0x13   : > { %v1731_v19 = vld [vmem:[%s2187_s2 + $0x70] sm:$0xff] (!%p218_p10)  ;;  %1245 = vmatprep.subr.bf16.mxu0 (!%p218_p10), %v1244_v9  ;;  %v1743_v21 = vld [vmem:[%s2187_s2 + $0x88] sm:$0xff] (!%p218_p10)  ;;  %v1748_v22 = vld [vmem:[%s2187_s2 + $0x98] sm:$0xff] (!%p218_p10)  ;;  %v1252_v28 = vpack.c.bf16 (!%p218_p10), %v637_v17, %v635_v15  ;;  %s2137_s12 = scalar_lea.hbm (!%p218_p10), %s2189_s4, %s1186_s6 }
  0x14   : > { %v1254_v29 = vpack.c.bf16 (!%p218_p10), %v1731_v19, %v1726_v18  ;;  %v1256_v30 = vpack.c.bf16 (!%p218_p10), %v1748_v22, %v1743_v21 }
  0x16   : > { %s1690_s11 = scalar_select %p266_p11, %s1579_s18, 1  ;;  %1247 = vmatpush1.bf16.msra.mxu0 %v1246_v16 }
  0x17   : > { %1249 = vmatprep.subr.bf16.mxu0 %v1248_v20  ;;  %s1593_s18 = smov [#allocation2]  }
  0x18   : > { %s1304_s8 = smul.u32 136, %s1690_s11  ;;  %s1513_s14 = sshll.u32 %s1593_s18, 4  ;;  %s1514_s14 = int_to_ptr.vmem [resolvable:$false] %s1513_s14 }
  0x1a   : > { %s1738_s9 = scalar_lea.vmem %s2185_s0, %s1304_s8  ;;  %1251 = vmatpush1.bf16.msra.mxu0 %v1250_v27  ;;  %s1185_s13 = sadd.s32 128, %s1304_s8 }
  0x1b   : > { %v1752_v24 = vld [vmem:[%s1738_s9] sm:$0xff]  ;;  %v1755_v25 = vld [vmem:[%s1738_s9 + $0x8] sm:$0xff]  ;;  %v1758_v26 = vld [vmem:[%s1738_s9 + $0x10] sm:$0xff]  ;;  %1253 = vmatprep.subr.bf16.mxu0 %v1252_v28  ;;  %s288_s26 = scalar_lea.vmem %s2186_s1, %s1185_s13 }
  0x1c   : > { %v326_v31 = vrot.slane %v1752_v24, 1  ;;  %v327_v32 = vrot.slane %v1755_v25, 1  ;;  %v329_v33 = vrot.slane %v1758_v26, 1  ;;  %v490_v34 = vrot.slane %v1752_v24, 3  ;;  %v1769_v35 = vld [vmem:[%s1738_s9 + $0x18] sm:$0xff]  ;;  %v1776_v40 = vld [vmem:[%s1738_s9 + $0x20] sm:$0xff] }
  0x1d   : > { %v491_v36 = vrot.slane %v1755_v25, 3  ;;  %v493_v37 = vrot.slane %v1758_v26, 3  ;;  %v408_v38 = vrot.slane %v1752_v24, 2  ;;  %v409_v39 = vrot.slane %v1755_v25, 2  ;;  %v1786_v49 = vld [vmem:[%s1738_s9 + $0x28] sm:$0xff]  ;;  %v1789_v50 = vld [vmem:[%s1738_s9 + $0x30] sm:$0xff] }
  0x1e   : > { %v328_v41 = vsel %vm325_vm0, %v326_v31, %v327_v32  ;;  %v330_v42 = vsel %vm325_vm0, %v327_v32, %v329_v33  ;;  %v411_v43 = vrot.slane %v1758_v26, 2  ;;  %v331_v44 = vrot.slane %v1769_v35, 1  ;;  %v1808_v4 = vld [vmem:[%s1738_s9 + $0x38] sm:$0xff]  ;;  %v1811_v5 = vld [vmem:[%s1738_s9 + $0x40] sm:$0xff]  ;;  %1255 = vmatpush1.bf16.msra.mxu0 %v1254_v29  ;;  %v1836_v32 = vld [vmem:[%s1738_s9 + $0x48] sm:$0xff] }
  0x1f   : > { %v1368_v45 = vpack.i.bf16 %v330_v42, %v328_v41  ;;  %v492_v46 = vsel %vm489_vm1, %v490_v34, %v491_v36  ;;  %v494_v47 = vsel %vm489_vm1, %v491_v36, %v493_v37  ;;  %v410_v48 = vsel %vm407_vm2, %v408_v38, %v409_v39  ;;  %1257 = vmatprep.subr.bf16.mxu0 %v1256_v30 }
  0x20   : > { %v1378_v51 = vpack.i.bf16 %v494_v47, %v492_v46  ;;  %v412_v52 = vsel %vm407_vm2, %v409_v39, %v411_v43  ;;  %v332_v53 = vsel %vm325_vm0, %v329_v33, %v331_v44  ;;  %v333_v54 = vrot.slane %v1776_v40, 1  ;;  %v1839_v33 = vld [vmem:[%s1738_s9 + $0x50] sm:$0xff]  ;;  %v1852_v46 = vld [vmem:[%s1738_s9 + $0x58] sm:$0xff]  ;;  %v1855_v47 = vld [vmem:[%s1738_s9 + $0x60] sm:$0xff] }
  0x21   : > { %1369 = vrot.lane.b32.xlu0 %v1368_v45, %s1590_s21  ;;  %v1373_v55 = vpack.i.bf16 %v412_v52, %v410_v48  ;;  %v413_v56 = vrot.slane %v1769_v35, 2  ;;  %v415_v57 = vrot.slane %v1776_v40, 2  ;;  %v495_v58 = vrot.slane %v1769_v35, 3 }
  0x22   : > { %1379 = vrot.lane.b32.xlu1 %v1378_v51, %s1591_s22  ;;  %v334_v59 = vsel %vm325_vm0, %v331_v44, %v333_v54  ;;  %v497_v60 = vrot.slane %v1776_v40, 3  ;;  %v335_v61 = vrot.slane %v1786_v49, 1  ;;  %v337_v62 = vrot.slane %v1789_v50, 1 }
  0x23   : > { %v1383_v63 = vpack.i.bf16 %v334_v59, %v332_v53  ;;  %v414_v0 = vsel %vm407_vm2, %v411_v43, %v413_v56  ;;  %v416_v1 = vsel %vm407_vm2, %v413_v56, %v415_v57  ;;  %v496_v2 = vsel %vm489_vm1, %v493_v37, %v495_v58 }
  0x24   : > { %v498_v3 = vsel %vm489_vm1, %v495_v58, %v497_v60  ;;  %v1388_v6 = vpack.i.bf16 %v416_v1, %v414_v0  ;;  %v336_v7 = vsel %vm325_vm0, %v333_v54, %v335_v61  ;;  %v417_v8 = vrot.slane %v1786_v49, 2  ;;  %v1874_v0 = vld [vmem:[%s1738_s9 + $0x70] sm:$0xff]  ;;  %v638_v1 = vld [vmem:[%s2187_s2 + $0x80] sm:$0xff] }
  0x25   : > { %1374 = vrot.lane.b32.xlu0 %v1373_v55, %s1592_s24  ;;  %v419_v9 = vrot.slane %v1789_v50, 2  ;;  %v1393_v10 = vpack.i.bf16 %v498_v3, %v496_v2  ;;  %v338_v11 = vsel %vm325_vm0, %v335_v61, %v337_v62  ;;  %v499_v12 = vrot.slane %v1786_v49, 3 }
  0x26   : > { %1384 = vrot.lane.b32.xlu1 %v1383_v63, %s1590_s21  ;;  %v501_v13 = vrot.slane %v1789_v50, 3  ;;  %v418_v14 = vsel %vm407_vm2, %v415_v57, %v417_v8  ;;  %v339_v16 = vrot.slane %v1808_v4, 1  ;;  %v341_v17 = vrot.slane %v1811_v5, 1  ;;  %v1871_v63 = vld [vmem:[%s1738_s9 + $0x68] sm:$0xff] }
  0x27   : > { %v420_v15 = vsel %vm407_vm2, %v417_v8, %v419_v9  ;;  %v1398_v18 = vpack.i.bf16 %v338_v11, %v336_v7  ;;  %v421_v19 = vrot.slane %v1808_v4, 2  ;;  %v500_v21 = vsel %vm489_vm1, %v497_v60, %v499_v12  ;;  %v640_v8 = vld [vmem:[%s2187_s2 + $0x90] sm:$0xff] }
  0x28   : > { %v1403_v20 = vpack.i.bf16 %v420_v15, %v418_v14  ;;  %v502_v22 = vsel %vm489_vm1, %v499_v12, %v501_v13  ;;  %v423_v27 = vrot.slane %v1811_v5, 2  ;;  %v340_v28 = vsel %vm325_vm0, %v337_v62, %v339_v16  ;;  %v642_v15 = vld [vmem:[%s2187_s2 + $0xa0] sm:$0xff] }
  0x29   : > { %1389 = vrot.lane.b32.xlu0 %v1388_v6, %s1592_s24  ;;  %v342_v29 = vsel %vm325_vm0, %v339_v16, %v341_v17  ;;  %v503_v30 = vrot.slane %v1808_v4, 3  ;;  %v505_v31 = vrot.slane %v1811_v5, 3  ;;  %v1408_v34 = vpack.i.bf16 %v502_v22, %v500_v21  ;;  %v644_v16 = vld [vmem:[%s2187_s2 + $0xb0] sm:$0xff]  ;;  %v647_v21 = vld [vmem:[%s2187_s2 + $0xc8] sm:$0xff]  ;;  %v649_v22 = vld [vmem:[%s2187_s2 + $0xd8] sm:$0xff] }
  0x2a   : > { %1394 = vrot.lane.b32.xlu1 %v1393_v10, %s1591_s22  ;;  %v422_v36 = vsel %vm407_vm2, %v419_v9, %v421_v19  ;;  %v1413_v37 = vpack.i.bf16 %v342_v29, %v340_v28  ;;  %v424_v38 = vsel %vm407_vm2, %v421_v19, %v423_v27  ;;  %v343_v39 = vrot.slane %v1836_v32, 1  ;;  %v643_v9 = vld [vmem:[%s2187_s2 + $0xa8] sm:$0xff]  ;;  %v645_v10 = vld [vmem:[%s2187_s2 + $0xb8] sm:$0xff] }
  0x2b   : > { %v345_v41 = vrot.slane %v1839_v33, 1  ;;  %v504_v42 = vsel %vm489_vm1, %v501_v13, %v503_v30  ;;  %v506_v43 = vsel %vm489_vm1, %v503_v30, %v505_v31  ;;  %v425_v44 = vrot.slane %v1836_v32, 2 }
  0x2c   : > { %v427_v45 = vrot.slane %v1839_v33, 2  ;;  %v1418_v48 = vpack.i.bf16 %v424_v38, %v422_v36  ;;  %v507_v51 = vrot.slane %v1836_v32, 3  ;;  %v509_v52 = vrot.slane %v1839_v33, 3 }
  0x2d   : > { %1399 = vrot.lane.b32.xlu0 %v1398_v18, %s1590_s21  ;;  %v1423_v53 = vpack.i.bf16 %v506_v43, %v504_v42  ;;  %v344_v54 = vsel %vm325_vm0, %v341_v17, %v343_v39  ;;  %v346_v55 = vsel %vm325_vm0, %v343_v39, %v345_v41  ;;  %v426_v56 = vsel %vm407_vm2, %v423_v27, %v425_v44  ;;  %v646_v39 = vld [vmem:[%s2187_s2 + $0xc0] sm:$0xff] }
  0x2e   : > { %1404 = vrot.lane.b32.xlu1 %v1403_v20, %s1592_s24  ;;  %v428_v57 = vsel %vm407_vm2, %v425_v44, %v427_v45  ;;  %v347_v58 = vrot.slane %v1852_v46, 1  ;;  %v349_v59 = vrot.slane %v1855_v47, 1  ;;  %v1428_v60 = vpack.i.bf16 %v346_v55, %v344_v54  ;;  %v651_v44 = vld [vmem:[%s2187_s2 + $0xe8] sm:$0xff] }
  0x2f   : > { %v508_v61 = vsel %vm489_vm1, %v505_v31, %v507_v51  ;;  %v510_v62 = vsel %vm489_vm1, %v507_v51, %v509_v52  ;;  %v1433_v2 = vpack.i.bf16 %v428_v57, %v426_v56  ;;  %v429_v3 = vrot.slane %v1852_v46, 2  ;;  %v1938_v57 = vld [vmem:[%s1738_s9 + $0x78] sm:$0xff] }
  0x30   : > { %v431_v6 = vrot.slane %v1855_v47, 2  ;;  %v511_v7 = vrot.slane %v1852_v46, 3  ;;  %v348_v11 = vsel %vm325_vm0, %v345_v41, %v347_v58  ;;  %v350_v12 = vsel %vm325_vm0, %v347_v58, %v349_v59  ;;  %v648_v41 = vld [vmem:[%s2187_s2 + $0xd0] sm:$0xff] }
  0x31   : > { %1409 = vrot.lane.b32.xlu0 %v1408_v34, %s1591_s22  ;;  %v513_v13 = vrot.slane %v1855_v47, 3  ;;  %v1438_v14 = vpack.i.bf16 %v510_v62, %v508_v61  ;;  %v351_v17 = vrot.slane %v1871_v63, 1  ;;  %v353_v18 = vrot.slane %v1874_v0, 1 }
  0x32   : > { %1414 = vrot.lane.b32.xlu1 %v1413_v37, %s1590_s21  ;;  %v1258_v19 = vpack.c.bf16 %v640_v8, %v638_v1  ;;  %v1260_v20 = vpack.c.bf16 %v645_v10, %v643_v9  ;;  %v1443_v27 = vpack.i.bf16 %v350_v12, %v348_v11  ;;  %v430_v28 = vsel %vm407_vm2, %v427_v45, %v429_v3  ;;  %v653_v45 = vld [vmem:[%s2187_s2 + $0xf8] sm:$0xff]  ;;  %v307_v11 = vld [vmem:[%s288_s26] sm:$0xff]  ;;  %s1515_s26 = scalar_lea.vmem %s1514_s14, 512 }
  0x33   : > { %v432_v29 = vsel %vm407_vm2, %v429_v3, %v431_v6  ;;  %v512_v30 = vsel %vm489_vm1, %v509_v52, %v511_v7  ;;  %v514_v31 = vsel %vm489_vm1, %v511_v7, %v513_v13  ;;  %v433_v34 = vrot.slane %v1871_v63, 2 }
  0x34   : > { %v435_v36 = vrot.slane %v1874_v0, 2  ;;  %1259 = vmatpush1.bf16.msra.mxu0 %v1258_v19  ;;  %v1262_v37 = vpack.c.bf16 %v644_v16, %v642_v15  ;;  %v1264_v38 = vpack.c.bf16 %v649_v22, %v647_v21  ;;  %v1448_v42 = vpack.i.bf16 %v432_v29, %v430_v28 }
  0x35   : > { %1419 = vrot.lane.b32.xlu0 %v1418_v48, %s1592_s24  ;;  %1261 = vmatprep.subr.bf16.mxu0 %v1260_v20  ;;  %v352_v43 = vsel %vm325_vm0, %v349_v59, %v351_v17  ;;  %v1453_v48 = vpack.i.bf16 %v514_v31, %v512_v30  ;;  %v354_v51 = vsel %vm325_vm0, %v351_v17, %v353_v18  ;;  %v515_v52 = vrot.slane %v1871_v63, 3  ;;  %v650_v59 = vld [vmem:[%s2187_s2 + $0xe0] sm:$0xff] }
  0x36   : > { %1424 = vrot.lane.b32.xlu1 %v1423_v53, %s1591_s22  ;;  %v517_v53 = vrot.slane %v1874_v0, 3  ;;  %v434_v54 = vsel %vm407_vm2, %v431_v6, %v433_v34  ;;  %v436_v55 = vsel %vm407_vm2, %v433_v34, %v435_v36  ;;  %v1266_v56 = vpack.c.bf16 %v648_v41, %v646_v39 }
  0x37   : > { %v1268_v58 = vpack.c.bf16 %v653_v45, %v651_v44  ;;  %v1458_v61 = vpack.i.bf16 %v354_v51, %v352_v43  ;;  %v1463_v62 = vpack.i.bf16 %v436_v55, %v434_v54  ;;  %v516_v1 = vsel %vm489_vm1, %v513_v13, %v515_v52 }
  0x38   : > { %1263 = vmatpush1.bf16.msra.mxu0 %v1262_v37  ;;  %v355_v3 = vrot.slane %v1938_v57, 1  ;;  %v437_v8 = vrot.slane %v1938_v57, 2  ;;  %v519_v10 = vrot.slane %v1938_v57, 3  ;;  %v357_v13 = vrot.slane %v307_v11, 1 }
  0x39   : > { %1429 = vrot.lane.b32.xlu0 %v1428_v60, %s1590_s21  ;;  %1265 = vmatprep.subr.bf16.mxu0 %v1264_v38  ;;  %v652_v60 = vld [vmem:[%s2187_s2 + $0xf0] sm:$0xff]  ;;  %v439_v15 = vrot.slane %v307_v11, 2  ;;  %v521_v17 = vrot.slane %v307_v11, 3 }
  0x3a   : > { %1434 = vrot.lane.b32.xlu1 %v1433_v2, %s1592_s24  ;;  %v518_v2 = vsel %vm489_vm1, %v515_v52, %v517_v53  ;;  %v1270_v6 = vpack.c.bf16 %v652_v60, %v650_v59  ;;  %v356_v9 = vsel %vm325_vm0, %v353_v18, %v355_v3  ;;  %v438_v12 = vsel %vm407_vm2, %v435_v36, %v437_v8 }
  0x3b   : > { %v1468_v7 = vpack.i.bf16 %v518_v2, %v516_v1  ;;  %v358_v16 = vsel %vm325_vm0, %v355_v3, %v357_v13  ;;  %v440_v18 = vsel %vm407_vm2, %v437_v8, %v439_v15  ;;  %v522_v19 = vsel %vm489_vm1, %v519_v10, %v521_v17 }
  0x3c   : > { %1267 = vmatpush1.bf16.msra.mxu0 %v1266_v56 }
  0x3d   : > { %1439 = vrot.lane.b32.xlu0 %v1438_v14, %s1591_s22  ;;  %1269 = vmatprep.subr.bf16.mxu0 %v1268_v58  ;;  %v520_v14 = vsel %vm489_vm1, %v517_v53, %v519_v10 }
  0x3e   : > { %1444 = vrot.lane.b32.xlu1 %v1443_v27, %s1590_s21 }
  0x40   : > { %1271 = vmatpush1.bf16.msra.mxu0 %v1270_v6 }
  0x41   : > { %1449 = vrot.lane.b32.xlu0 %v1448_v42, %s1592_s24 }
  0x42   : > { %1454 = vrot.lane.b32.xlu1 %v1453_v48, %s1591_s22 }
  0x45   : > { %1459 = vrot.lane.b32.xlu0 %v1458_v61, %s1590_s21 }
  0x46   : > { %1464 = vrot.lane.b32.xlu1 %v1463_v62, %s1592_s24 }
  0x49   : > { %1469 = vrot.lane.b32.xlu0 %v1468_v7, %s1591_s22 }
  0x4a   : > { %387 = vrot.lane.b32.xlu1 %v356_v9, %s1590_s21 }
  0x4d   : > { %469 = vrot.lane.b32.xlu0 %v438_v12, %s1592_s24 }
  0x4e   : > { %551 = vrot.lane.b32.xlu1 %v520_v14, %s1591_s22 }
  0x51   : > { %389 = vrot.lane.b32.xlu0 %v358_v16, %s1590_s21 }
  0x52   : > { %471 = vrot.lane.b32.xlu1 %v440_v18, %s1592_s24  ;;  %s258_s24 = sand.u32 1, %s1571_s16  }
  0x53   : > { %s1176_s29 = sshll.u32 %s258_s24, 4  ;;  %s2139_s13 = scalar_lea.sflag [#allocation3], %s258_s24 }
  0x54   : > { %s260_s30 = scalar_lea.vmem [#allocation2], %s1176_s29 }
  0x55   : > { %553 = vrot.lane.b32.xlu0 %v522_v19, %s1591_s22  ;;  %s1075_s5 = sshll.u32 %s260_s30, 4  ;;  %s2132_s5 = int_to_ptr.vmem [resolvable:$true] %s1075_s5 }
  0x56   : > { %s1509_s9 = scalar_lea.vmem %s2132_s5, 256  ;;  %p1516_p1 = scmp.lt.s32.totalorder %s2132_s5, %s1514_s14 }
  0x57   : > { %p1510_p12 = scmp.ne.s32.totalorder %s2132_s5, %s1509_s9  ;;  %p1517_p2 = scmp.lt.s32.totalorder %s1515_s26, %s1509_s9 }
  0x59   : > { %p1511_p13 = pnand %p1510_p12, %p1661_p4  ;;  %p1518_p3 = por %p1517_p2, %p1516_p1 }
  0x5b   : > { %p1512_p0 = pneg %p1511_p13 }
  0x5d   : > { %p1519_p5 = pnand %p1518_p3, %p1512_p0 }
  0x93   : > { %v1370_v20 = vpop.permute.xlu0 %1369 }
  0x94   : > { %v1380_v21 = vpop.permute.xlu1 %1379  ;;  %v1371_v22 = vunpack.i.l.bf16 %v1370_v20  ;;  %v1372_v27 = vunpack.i.h.bf16 %v1370_v20 }
  0x95   : > { %v1381_v28 = vunpack.i.l.bf16 %v1380_v21  ;;  %v1382_v39 = vunpack.i.h.bf16 %v1380_v21 }
  0x96   : > { %v572_v37 = vsel %vm571_vm3, %v1752_v24, %v1371_v22  ;;  %v573_v43 = vsel %vm571_vm3, %v1755_v25, %v1372_v27 }
  0x97   : > { %v1375_v29 = vpop.permute.xlu0 %1374 }
  0x98   : > { %v1377_v30 = vunpack.i.h.bf16 %v1375_v29  ;;  %v1376_v31 = vunpack.i.l.bf16 %v1375_v29  ;;  %v1385_v34 = vpop.permute.xlu1 %1384 }
  0x99   : > { %v1386_v36 = vunpack.i.l.bf16 %v1385_v34  ;;  %v1387_v51 = vunpack.i.h.bf16 %v1385_v34 }
  0x9a   : > { %v589_v38 = vsel %vm588_vm4, %v572_v37, %v1376_v31  ;;  %v590_v48 = vsel %vm588_vm4, %v573_v43, %v1377_v30 }
  0x9b   : > { %v606_v41 = vsel %vm605_vm5, %v589_v38, %v1381_v28  ;;  %v1390_v42 = vpop.permute.xlu0 %1389  ;;  %v574_v24 = vsel %vm571_vm3, %v1758_v26, %v1386_v36  ;;  %v607_v53 = vsel %vm605_vm5, %v590_v48, %v1382_v39  ;;  %v575_v59 = vsel %vm571_vm3, %v1769_v35, %v1387_v51 }
  0x9c   : > { %719 = vmatmul.mubr.f32.vlgmr.msra.gmra.mrb[0].mxu0 %v606_v41  ;;  %v1391_v44 = vunpack.i.l.bf16 %v1390_v42  ;;  %v1395_v45 = vpop.permute.xlu1 %1394  ;;  %v1392_v55 = vunpack.i.h.bf16 %v1390_v42 }
  0x9d   : > { %724 = vmatprep.mubr.f32.mxu0 %v1589_v23  ;;  %v1396_v52 = vunpack.i.l.bf16 %v1395_v45  ;;  %v1397_v60 = vunpack.i.h.bf16 %v1395_v45 }
  0x9e   : > { %v591_v56 = vsel %vm588_vm4, %v574_v24, %v1391_v44  ;;  %v592_v1 = vsel %vm588_vm4, %v575_v59, %v1392_v55 }
  0x9f   : > { %v1400_v54 = vpop.permute.xlu0 %1399  ;;  %v608_v61 = vsel %vm605_vm5, %v591_v56, %v1396_v52  ;;  %v609_v8 = vsel %vm605_vm5, %v592_v1, %v1397_v60 }
  0xa0   : > { %725 = vmatmul.mubr.f32.gmra.mrb[2].mxu0 %v607_v53  ;;  %v1405_v25 = vpop.permute.xlu1 %1404  ;;  %v1401_v58 = vunpack.i.l.bf16 %v1400_v54  ;;  %v1402_v2 = vunpack.i.h.bf16 %v1400_v54 }
  0xa1   : > { %730 = vmatprep.mubr.f32.mxu0 %v1589_v23  ;;  %v1406_v26 = vunpack.i.l.bf16 %v1405_v25  ;;  %v1407_v9 = vunpack.i.h.bf16 %v1405_v25 }
  0xa2   : > { %v576_v3 = vsel %vm571_vm3, %v1776_v40, %v1401_v58  ;;  %v577_v12 = vsel %vm571_vm3, %v1786_v49, %v1402_v2 }
  0xa3   : > { %v1410_v62 = vpop.permute.xlu0 %1409  ;;  %v593_v35 = vsel %vm588_vm4, %v576_v3, %v1406_v26  ;;  %v594_v16 = vsel %vm588_vm4, %v577_v12, %v1407_v9 }
  0xa4   : > { %731 = vmatmul.mubr.f32.gmra.mrb[4].mxu0 %v608_v61  ;;  %v1415_v6 = vpop.permute.xlu1 %1414  ;;  %v1411_v7 = vunpack.i.l.bf16 %v1410_v62  ;;  %v1412_v13 = vunpack.i.h.bf16 %v1410_v62 }
  0xa5   : > { %736 = vmatprep.mubr.f32.mxu0 %v1589_v23  ;;  %v1416_v11 = vunpack.i.l.bf16 %v1415_v6  ;;  %v1417_v17 = vunpack.i.h.bf16 %v1415_v6 }
  0xa6   : > { %v610_v14 = vsel %vm605_vm5, %v593_v35, %v1411_v7  ;;  %v611_v21 = vsel %vm605_vm5, %v594_v16, %v1412_v13 }
  0xa7   : > { %v1420_v10 = vpop.permute.xlu0 %1419  ;;  %v578_v18 = vsel %vm571_vm3, %v1789_v50, %v1416_v11  ;;  %v579_v29 = vsel %vm571_vm3, %v1808_v4, %v1417_v17 }
  0xa8   : > { %737 = vmatmul.mubr.f32.gmra.mrb[6].mxu0 %v609_v8  ;;  %v1421_v40 = vunpack.i.l.bf16 %v1420_v10  ;;  %v1425_v15 = vpop.permute.xlu1 %1424  ;;  %v1422_v22 = vunpack.i.h.bf16 %v1420_v10 }
  0xa9   : > { %742 = vmatprep.mubr.f32.mxu0 %v1589_v23  ;;  %v1426_v20 = vunpack.i.l.bf16 %v1425_v15  ;;  %v1427_v30 = vunpack.i.h.bf16 %v1425_v15 }
  0xaa   : > { %v595_v49 = vsel %vm588_vm4, %v578_v18, %v1421_v40  ;;  %v596_v36 = vsel %vm588_vm4, %v579_v29, %v1422_v22 }
  0xab   : > { %v1430_v19 = vpop.permute.xlu0 %1429  ;;  %v612_v31 = vsel %vm605_vm5, %v595_v49, %v1426_v20  ;;  %v613_v42 = vsel %vm605_vm5, %v596_v36, %v1427_v30  ;;  %v975_v49 = vld [vmem:[%s2188_s3] sm:$0xff] }
  0xac   : > { %743 = vmatmul.mubr.f32.gmra.mrb[8].mxu0 %v610_v14  ;;  %v1435_v27 = vpop.permute.xlu1 %1434  ;;  %v1431_v28 = vunpack.i.l.bf16 %v1430_v19  ;;  %v1432_v37 = vunpack.i.h.bf16 %v1430_v19  ;;  %1237 = vmatprep.mubr.f32.mxu1 %v975_v49 }
  0xad   : > { %748 = vmatprep.mubr.f32.mxu0 %v1589_v23  ;;  %v1436_v50 = vunpack.i.l.bf16 %v1435_v27  ;;  %v1437_v43 = vunpack.i.h.bf16 %v1435_v27 }
  0xae   : > { %v580_v38 = vsel %vm571_vm3, %v1811_v5, %v1431_v28  ;;  %v581_v48 = vsel %vm571_vm3, %v1836_v32, %v1432_v37 }
  0xaf   : > { %v1440_v34 = vpop.permute.xlu0 %1439  ;;  %v597_v4 = vsel %vm588_vm4, %v580_v38, %v1436_v50  ;;  %v598_v53 = vsel %vm588_vm4, %v581_v48, %v1437_v43 }
  0xb0   : > { %749 = vmatmul.mubr.f32.gmra.mrb[10].mxu0 %v611_v21  ;;  %v1445_v39 = vpop.permute.xlu1 %1444  ;;  %v1441_v41 = vunpack.i.l.bf16 %v1440_v34  ;;  %v1442_v51 = vunpack.i.h.bf16 %v1440_v34 }
  0xb1   : > { %754 = vmatprep.mubr.f32.mxu0 %v1589_v23  ;;  %v1446_v45 = vunpack.i.l.bf16 %v1445_v39  ;;  %v1447_v54 = vunpack.i.h.bf16 %v1445_v39 }
  0xb2   : > { %v614_v24 = vsel %vm605_vm5, %v597_v4, %v1441_v41  ;;  %v615_v58 = vsel %vm605_vm5, %v598_v53, %v1442_v51 }
  0xb3   : > { %v1450_v44 = vpop.permute.xlu0 %1449  ;;  %v582_v55 = vsel %vm571_vm3, %v1839_v33, %v1446_v45  ;;  %v583_v26 = vsel %vm571_vm3, %v1852_v46, %v1447_v54 }
  0xb4   : > { %755 = vmatmul.mubr.f32.gmra.mrb[12].mxu0 %v612_v31  ;;  %v1451_v5 = vunpack.i.l.bf16 %v1450_v44  ;;  %v1455_v52 = vpop.permute.xlu1 %1454  ;;  %v1452_v59 = vunpack.i.h.bf16 %v1450_v44 }
  0xb5   : > { %760 = vmatprep.mubr.f32.mxu0 %v1589_v23  ;;  %v1456_v25 = vunpack.i.l.bf16 %v1455_v52  ;;  %v1457_v62 = vunpack.i.h.bf16 %v1455_v52 }
  0xb6   : > { %v599_v32 = vsel %vm588_vm4, %v582_v55, %v1451_v5  ;;  %v600_v3 = vsel %vm588_vm4, %v583_v26, %v1452_v59 }
  0xb7   : > { %v1460_v56 = vpop.permute.xlu0 %1459  ;;  %v616_v1 = vsel %vm605_vm5, %v599_v32, %v1456_v25  ;;  %v617_v35 = vsel %vm605_vm5, %v600_v3, %v1457_v62 }
  0xb8   : > { %761 = vmatmul.mubr.f32.gmra.mrb[14].mxu0 %v613_v42  ;;  %v1461_v60 = vunpack.i.l.bf16 %v1460_v56  ;;  %v1465_v61 = vpop.permute.xlu1 %1464  ;;  %v1462_v6 = vunpack.i.h.bf16 %v1460_v56 }
  0xb9   : > { %766 = vmatprep.mubr.f32.mxu0 %v1589_v23  ;;  %v1466_v33 = vunpack.i.l.bf16 %v1465_v61  ;;  %v1467_v10 = vunpack.i.h.bf16 %v1465_v61 }
  0xba   : > { %v584_v8 = vsel %vm571_vm3, %v1855_v47, %v1461_v60  ;;  %v585_v12 = vsel %vm571_vm3, %v1871_v63, %v1462_v6 }
  0xbb   : > { %v1470_v2 = vpop.permute.xlu0 %1469  ;;  %v601_v11 = vsel %vm588_vm4, %v584_v8, %v1466_v33  ;;  %v602_v47 = vsel %vm588_vm4, %v585_v12, %v1467_v10 }
  0xbc   : > { %767 = vmatmul.mubr.f32.gmra.mrb[16].mxu0 %v614_v24  ;;  %v388_v7 = vpop.permute.xlu1 %387  ;;  %v1471_v9 = vunpack.i.l.bf16 %v1470_v2  ;;  %v1472_v13 = vunpack.i.h.bf16 %v1470_v2 }
  0xbd   : > { %772 = vmatprep.mubr.f32.mxu0 %v1589_v23  ;;  %v586_v15 = vsel %vm571_vm3, %v1874_v0, %v388_v7 }
  0xbe   : > { %v618_v14 = vsel %vm605_vm5, %v601_v11, %v1471_v9  ;;  %v619_v17 = vsel %vm605_vm5, %v602_v47, %v1472_v13 }
  0xbf   : > { %v470_v46 = vpop.permute.xlu0 %469 }
  0xc0   : > { %773 = vmatmul.mubr.f32.gmra.mrb[18].mxu0 %v615_v58  ;;  %v552_v40 = vpop.permute.xlu1 %551  ;;  %v603_v18 = vsel %vm588_vm4, %v586_v15, %v470_v46 }
  0xc1   : > { %778 = vmatprep.mubr.f32.mxu0 %v1589_v23  ;;  %v620_v20 = vsel %vm605_vm5, %v603_v18, %v552_v40 }
  0xc3   : > { %v390_v16 = vpop.permute.xlu0 %389 }
  0xc4   : > { %779 = vmatmul.mubr.f32.gmra.mrb[20].mxu0 %v616_v1  ;;  %v587_v63 = vsel %vm571_vm3, %v1938_v57, %v390_v16  ;;  %v472_v19 = vpop.permute.xlu1 %471 }
  0xc5   : > { %784 = vmatprep.mubr.f32.mxu0 %v1589_v23  ;;  %v604_v21 = vsel %vm588_vm4, %v587_v63, %v472_v19 }
  0xc7   : > { %v554_v22 = vpop.permute.xlu0 %553 }
  0xc8   : > { %785 = vmatmul.mubr.f32.gmra.mrb[22].mxu0 %v617_v35  ;;  %v621_v0 = vsel %vm605_vm5, %v604_v21, %v554_v22 }
  0xc9   : > { %790 = vmatprep.mubr.f32.mxu0 %v1589_v23 }
  0xcc   : > { %791 = vmatmul.mubr.f32.gmra.mrb[24].mxu0 %v618_v14 }
  0xcd   : > { %796 = vmatprep.mubr.f32.mxu0 %v1589_v23 }
  0xd0   : > { %797 = vmatmul.mubr.f32.gmra.mrb[26].mxu0 %v619_v17 }
  0xd1   : > { %802 = vmatprep.mubr.f32.mxu0 %v1589_v23 }
  0xd4   : > { %803 = vmatmul.mubr.f32.gmra.mrb[28].mxu0 %v620_v20 }
  0xd5   : > { %808 = vmatprep.mubr.f32.mxu0 %v1589_v23 }
  0xd8   : > { %809 = vmatmul.mubr.f32.gmra.mrb[30].mxu0 %v621_v0 }
 0x16f   : > { %v720_v57 = vpop.f32.mrb[0].mxu0 }
 0x170   : > { %v815_v27 = vmul.f32 %v720_v57, %v720_v57  ;;  %v722_v28 = vpop.f32.mrb[1].mxu0 }
 0x171   : > { %v831_v29 = vmul.f32 %v722_v28, %v722_v28 }
 0x173   : > { %v847_v30 = vadd.f32 %v831_v29, %v815_v27  ;;  %v726_v31 = vpop.f32.mrb[2].mxu0 }
 0x174   : > { %v816_v50 = vmul.f32 %v726_v31, %v726_v31  ;;  %v728_v34 = vpop.f32.mrb[3].mxu0 }
 0x175   : > { %v832_v36 = vmul.f32 %v728_v34, %v728_v34  ;;  %1473 = vrsqrt.f32 %v847_v30  ;;  %vm865_vm6 = vcmp.eq.f32.partialorder %v847_v30, inf  ;;  %v868_v60 = vand.u32 2147483648, %v847_v30 }
 0x176   : > { %vm867_vm8 = vcmp.eq.f32.partialorder %v847_v30, 0.0 }
 0x177   : > { %v848_v37 = vadd.f32 %v832_v36, %v816_v50  ;;  %v732_v23 = vpop.f32.mrb[4].mxu0 }
 0x178   : > { %v817_v38 = vmul.f32 %v732_v23, %v732_v23  ;;  %v734_v39 = vpop.f32.mrb[5].mxu0 }
 0x179   : > { %v833_v41 = vmul.f32 %v734_v39, %v734_v39  ;;  %1475 = vrsqrt.f32 %v848_v37  ;;  %vm872_vm7 = vcmp.eq.f32.partialorder %v848_v37, inf  ;;  %v875_v62 = vand.u32 2147483648, %v848_v37 }
 0x17a   : > { %vm874_vm9 = vcmp.eq.f32.partialorder %v848_v37, 0.0 }
 0x17b   : > { %v2055_v42 = vadd.f32 %v833_v41, %v817_v38  ;;  %v738_v43 = vpop.f32.mrb[6].mxu0 }
 0x17c   : > { %v818_v4 = vmul.f32 %v738_v43, %v738_v43  ;;  %v740_v44 = vpop.f32.mrb[7].mxu0 }
 0x17d   : > { %1477 = vrsqrt.f32 %v2055_v42  ;;  %v834_v45 = vmul.f32 %v740_v44, %v740_v44  ;;  %vm879_vm10 = vcmp.eq.f32.partialorder %v2055_v42, inf  ;;  %v882_v15 = vand.u32 2147483648, %v2055_v42 }
 0x17e   : > { %vm881_vm12 = vcmp.eq.f32.partialorder %v2055_v42, 0.0 }
 0x17f   : > { %v1474_v48 = vpop.eup %1473  ;;  %v850_v51 = vadd.f32 %v834_v45, %v818_v4  ;;  %v744_v24 = vpop.f32.mrb[8].mxu0 }
 0x180   : > { %v819_v5 = vmul.f32 %v744_v24, %v744_v24  ;;  %v746_v52 = vpop.f32.mrb[9].mxu0  ;;  %v864_v53 = vmul.f32 %v1474_v48, %v847_v30 }
 0x181   : > { %1479 = vrsqrt.f32 %v850_v51  ;;  %v835_v54 = vmul.f32 %v746_v52, %v746_v52  ;;  %vm886_vm11 = vcmp.eq.f32.partialorder %v850_v51, inf  ;;  %v889_v18 = vand.u32 2147483648, %v850_v51 }
 0x182   : > { %v866_v32 = vsel %vm865_vm6, %v847_v30, %v864_v53  ;;  %vm888_vm13 = vcmp.eq.f32.partialorder %v850_v51, 0.0 }
 0x183   : > { %v1476_v55 = vpop.eup %1475  ;;  %v2058_v56 = vadd.f32 %v835_v54, %v819_v5  ;;  %v750_v25 = vpop.f32.mrb[10].mxu0  ;;  %v869_v6 = vsel %vm867_vm8, %v868_v60, %v866_v32 }
 0x184   : > { %v820_v58 = vmul.f32 %v750_v25, %v750_v25  ;;  %v752_v59 = vpop.f32.mrb[11].mxu0  ;;  %v871_v61 = vmul.f32 %v1476_v55, %v848_v37 }
 0x185   : > { %1481 = vrsqrt.f32 %v2058_v56  ;;  %v836_v26 = vmul.f32 %v752_v59, %v752_v59  ;;  %vm893_vm14 = vcmp.eq.f32.partialorder %v2058_v56, inf  ;;  %v896_v23 = vand.u32 2147483648, %v2058_v56 }
 0x186   : > { %v873_v1 = vsel %vm872_vm7, %v848_v37, %v871_v61  ;;  %vm895_vm0 = vcmp.eq.f32.partialorder %v2058_v56, 0.0 }
 0x187   : > { %v1478_v33 = vpop.eup %1477  ;;  %v2061_v2 = vadd.f32 %v836_v26, %v820_v58  ;;  %v756_v3 = vpop.f32.mrb[12].mxu0  ;;  %v876_v7 = vsel %vm874_vm9, %v875_v62, %v873_v1 }
 0x188   : > { %v821_v8 = vmul.f32 %v756_v3, %v756_v3  ;;  %v758_v9 = vpop.f32.mrb[13].mxu0  ;;  %v1272_v35 = vpack.c.bf16 %v876_v7, %v869_v6  ;;  %v878_v10 = vmul.f32 %v1478_v33, %v2055_v42 }
 0x189   : > { %1483 = vrsqrt.f32 %v2061_v2  ;;  %v837_v46 = vmul.f32 %v758_v9, %v758_v9  ;;  %vm900_vm15 = vcmp.eq.f32.partialorder %v2061_v2, inf  ;;  %v903_v41 = vand.u32 2147483648, %v2061_v2 }
 0x18a   : > { %1273 = vmatprep.subr.bf16.mxu1 %v1272_v35  ;;  %v880_v47 = vsel %vm879_vm10, %v2055_v42, %v878_v10  ;;  %vm902_vm1 = vcmp.eq.f32.partialorder %v2061_v2, 0.0 }
 0x18b   : > { %v1480_v11 = vpop.eup %1479  ;;  %v2065_v12 = vadd.f32 %v837_v46, %v821_v8  ;;  %v762_v13 = vpop.f32.mrb[14].mxu0  ;;  %1275 = vmatpush3.bf16.xpose.msra.mxu1 %v1272_v35  ;;  %v883_v22 = vsel %vm881_vm12, %v882_v15, %v880_v47 }
 0x18c   : > { %v822_v14 = vmul.f32 %v762_v13, %v762_v13  ;;  %v764_v40 = vpop.f32.mrb[15].mxu0  ;;  %v885_v16 = vmul.f32 %v1480_v11, %v850_v51 }
 0x18d   : > { %1485 = vrsqrt.f32 %v2065_v12  ;;  %v838_v17 = vmul.f32 %v764_v40, %v764_v40  ;;  %vm907_vm2 = vcmp.eq.f32.partialorder %v2065_v12, inf  ;;  %v910_v32 = vand.u32 2147483648, %v2065_v12 }
 0x18e   : > { %v887_v63 = vsel %vm886_vm11, %v850_v51, %v885_v16  ;;  %vm909_vm4 = vcmp.eq.f32.partialorder %v2065_v12, 0.0 }
 0x18f   : > { %v1482_v19 = vpop.eup %1481  ;;  %v2072_v20 = vadd.f32 %v838_v17, %v822_v14  ;;  %v768_v21 = vpop.f32.mrb[16].mxu0  ;;  %v890_v0 = vsel %vm888_vm13, %v889_v18, %v887_v63 }
 0x190   : > { %v823_v49 = vmul.f32 %v768_v21, %v768_v21  ;;  %v770_v57 = vpop.f32.mrb[17].mxu0  ;;  %v1276_v27 = vpack.c.bf16 %v890_v0, %v883_v22  ;;  %v892_v28 = vmul.f32 %v1482_v19, %v2058_v56 }
 0x191   : > { %1487 = vrsqrt.f32 %v2072_v20  ;;  %v839_v29 = vmul.f32 %v770_v57, %v770_v57  ;;  %vm914_vm3 = vcmp.eq.f32.partialorder %v2072_v20, inf  ;;  %v917_v26 = vand.u32 2147483648, %v2072_v20 }
 0x192   : > { %1277 = vmatprep.subr.bf16.mxu1 %v1276_v27  ;;  %v894_v37 = vsel %vm893_vm14, %v2058_v56, %v892_v28  ;;  %vm916_vm5 = vcmp.eq.f32.partialorder %v2072_v20, 0.0 }
 0x193   : > { %v1484_v30 = vpop.eup %1483  ;;  %v2076_v31 = vadd.f32 %v839_v29, %v823_v49  ;;  %v774_v50 = vpop.f32.mrb[18].mxu0  ;;  %1279 = vmatpush3.bf16.xpose.msra.mxu1 %v1276_v27  ;;  %v897_v45 = vsel %vm895_vm0, %v896_v23, %v894_v37 }
 0x194   : > { %v824_v34 = vmul.f32 %v774_v50, %v774_v50  ;;  %v776_v36 = vpop.f32.mrb[19].mxu0  ;;  %v899_v38 = vmul.f32 %v1484_v30, %v2061_v2 }
 0x195   : > { %1489 = vrsqrt.f32 %v2076_v31  ;;  %v840_v39 = vmul.f32 %v776_v36, %v776_v36  ;;  %vm921_vm6 = vcmp.eq.f32.partialorder %v2076_v31, inf  ;;  %v924_v47 = vand.u32 2147483648, %v2076_v31 }
 0x196   : > { %v901_v42 = vsel %vm900_vm15, %v2061_v2, %v899_v38  ;;  %vm923_vm8 = vcmp.eq.f32.partialorder %v2076_v31, 0.0 }
 0x197   : > { %v1486_v43 = vpop.eup %1485  ;;  %v2088_v4 = vadd.f32 %v840_v39, %v824_v34  ;;  %v780_v44 = vpop.f32.mrb[20].mxu0  ;;  %v904_v48 = vsel %vm902_vm1, %v903_v41, %v901_v42 }
 0x198   : > { %v825_v51 = vmul.f32 %v780_v44, %v780_v44  ;;  %v782_v24 = vpop.f32.mrb[21].mxu0  ;;  %v1280_v5 = vpack.c.bf16 %v904_v48, %v897_v45  ;;  %v906_v52 = vmul.f32 %v1486_v43, %v2065_v12 }
 0x199   : > { %1491 = vrsqrt.f32 %v2088_v4  ;;  %v841_v53 = vmul.f32 %v782_v24, %v782_v24  ;;  %vm928_vm7 = vcmp.eq.f32.partialorder %v2088_v4, inf  ;;  %v931_v17 = vand.u32 2147483648, %v2088_v4 }
 0x19a   : > { %1281 = vmatprep.subr.bf16.mxu1 %v1280_v5  ;;  %v908_v59 = vsel %vm907_vm2, %v2065_v12, %v906_v52  ;;  %vm930_vm9 = vcmp.eq.f32.partialorder %v2088_v4, 0.0 }
 0x19b   : > { %v1488_v54 = vpop.eup %1487  ;;  %v2092_v55 = vadd.f32 %v841_v53, %v825_v51  ;;  %v786_v56 = vpop.f32.mrb[22].mxu0  ;;  %1283 = vmatpush3.bf16.xpose.msra.mxu1 %v1280_v5  ;;  %v911_v3 = vsel %vm909_vm4, %v910_v32, %v908_v59 }
 0x19c   : > { %v826_v25 = vmul.f32 %v786_v56, %v786_v56  ;;  %v788_v58 = vpop.f32.mrb[23].mxu0  ;;  %v913_v60 = vmul.f32 %v1488_v54, %v2072_v20 }
 0x19d   : > { %1493 = vrsqrt.f32 %v2092_v55  ;;  %v842_v61 = vmul.f32 %v788_v58, %v788_v58  ;;  %vm935_vm10 = vcmp.eq.f32.partialorder %v2092_v55, inf  ;;  %v938_v37 = vand.u32 2147483648, %v2092_v55 }
 0x19e   : > { %v915_v62 = vsel %vm914_vm3, %v2072_v20, %v913_v60  ;;  %vm937_vm12 = vcmp.eq.f32.partialorder %v2092_v55, 0.0 }
 0x19f   : > { %v1490_v1 = vpop.eup %1489  ;;  %v858_v33 = vadd.f32 %v842_v61, %v826_v25  ;;  %v792_v2 = vpop.f32.mrb[24].mxu0  ;;  %v918_v6 = vsel %vm916_vm5, %v917_v26, %v915_v62 }
 0x1a0   : > { %v827_v7 = vmul.f32 %v792_v2, %v792_v2  ;;  %v794_v8 = vpop.f32.mrb[25].mxu0  ;;  %v1284_v9 = vpack.c.bf16 %v918_v6, %v911_v3  ;;  %v920_v35 = vmul.f32 %v1490_v1, %v2076_v31  ;;  %v976_v6 = vld [vmem:[%s2188_s3 + $0x8] sm:$0xff] }
 0x1a1   : > { %1495 = vrsqrt.f32 %v858_v33  ;;  %v843_v10 = vmul.f32 %v794_v8, %v794_v8  ;;  %vm942_vm11 = vcmp.eq.f32.partialorder %v858_v33, inf  ;;  %v945_v39 = vand.u32 2147483648, %v858_v33 }
 0x1a2   : > { %1285 = vmatprep.subr.bf16.mxu1 %v1284_v9  ;;  %v922_v40 = vsel %vm921_vm6, %v2076_v31, %v920_v35  ;;  %vm944_vm13 = vcmp.eq.f32.partialorder %v858_v33, 0.0 }
 0x1a3   : > { %v1492_v46 = vpop.eup %1491  ;;  %v2105_v11 = vadd.f32 %v843_v10, %v827_v7  ;;  %v798_v12 = vpop.f32.mrb[26].mxu0  ;;  %1287 = vmatpush3.bf16.xpose.msra.mxu1 %v1284_v9  ;;  %v925_v21 = vsel %vm923_vm8, %v924_v47, %v922_v40 }
 0x1a4   : > { %v828_v13 = vmul.f32 %v798_v12, %v798_v12  ;;  %v800_v14 = vpop.f32.mrb[27].mxu0  ;;  %v927_v15 = vmul.f32 %v1492_v46, %v2088_v4 }
 0x1a5   : > { %1497 = vrsqrt.f32 %v2105_v11  ;;  %v844_v16 = vmul.f32 %v800_v14, %v800_v14  ;;  %vm949_vm14 = vcmp.eq.f32.partialorder %v2105_v11, inf  ;;  %v952_v52 = vand.u32 2147483648, %v2105_v11 }
 0x1a6   : > { %v929_v18 = vsel %vm928_vm7, %v2088_v4, %v927_v15  ;;  %vm951_vm0 = vcmp.eq.f32.partialorder %v2105_v11, 0.0 }
 0x1a7   : > { %v1494_v63 = vpop.eup %1493  ;;  %v860_v19 = vadd.f32 %v844_v16, %v828_v13  ;;  %v804_v20 = vpop.f32.mrb[28].mxu0  ;;  %v932_v22 = vsel %vm930_vm9, %v931_v17, %v929_v18 }
 0x1a8   : > { %v829_v0 = vmul.f32 %v804_v20, %v804_v20  ;;  %v806_v49 = vpop.f32.mrb[29].mxu0  ;;  %v1288_v57 = vpack.c.bf16 %v932_v22, %v925_v21  ;;  %v934_v27 = vmul.f32 %v1494_v63, %v2092_v55 }
 0x1a9   : > { %1499 = vrsqrt.f32 %v860_v19  ;;  %v845_v28 = vmul.f32 %v806_v49, %v806_v49  ;;  %vm956_vm15 = vcmp.eq.f32.partialorder %v860_v19, inf  ;;  %v959_v53 = vand.u32 2147483648, %v860_v19 }
 0x1aa   : > { %1289 = vmatprep.subr.bf16.mxu1 %v1288_v57  ;;  %v936_v36 = vsel %vm935_vm10, %v2092_v55, %v934_v27  ;;  %vm958_vm1 = vcmp.eq.f32.partialorder %v860_v19, 0.0 }
 0x1ab   : > { %v1496_v29 = vpop.eup %1495  ;;  %v861_v30 = vadd.f32 %v845_v28, %v829_v0  ;;  %v810_v31 = vpop.f32.mrb[30].mxu0  ;;  %1291 = vmatpush3.bf16.xpose.msra.mxu1 %v1288_v57  ;;  %v939_v4 = vsel %vm937_vm12, %v938_v37, %v936_v36 }
 0x1ac   : > { %v830_v50 = vmul.f32 %v810_v31, %v810_v31  ;;  %v812_v34 = vpop.f32.mrb[31].mxu0  ;;  %v941_v23 = vmul.f32 %v1496_v29, %v858_v33 }
 0x1ad   : > { %1501 = vrsqrt.f32 %v861_v30  ;;  %v846_v38 = vmul.f32 %v812_v34, %v812_v34  ;;  %vm963_vm2 = vcmp.eq.f32.partialorder %v861_v30, inf  ;;  %v966_v26 = vand.u32 2147483648, %v861_v30 }
 0x1ae   : > { %v943_v41 = vsel %vm942_vm11, %v858_v33, %v941_v23  ;;  %vm965_vm4 = vcmp.eq.f32.partialorder %v861_v30, 0.0 }
 0x1af   : > { %v1498_v42 = vpop.eup %1497  ;;  %v862_v43 = vadd.f32 %v846_v38, %v830_v50  ;;  %v946_v44 = vsel %vm944_vm13, %v945_v39, %v943_v41 }
 0x1b0   : > { %v1292_v45 = vpack.c.bf16 %v946_v44, %v939_v4  ;;  %v948_v48 = vmul.f32 %v1498_v42, %v2105_v11 }
 0x1b1   : > { %1503 = vrsqrt.f32 %v862_v43  ;;  %vm970_vm3 = vcmp.eq.f32.partialorder %v862_v43, inf  ;;  %v973_v62 = vand.u32 2147483648, %v862_v43  ;;  %vm972_vm5 = vcmp.eq.f32.partialorder %v862_v43, 0.0 }
 0x1b2   : > { %1293 = vmatprep.subr.bf16.mxu1 %v1292_v45  ;;  %v950_v24 = vsel %vm949_vm14, %v2105_v11, %v948_v48 }
 0x1b3   : > { %v1500_v51 = vpop.eup %1499  ;;  %1295 = vmatpush3.bf16.xpose.msra.mxu1 %v1292_v45  ;;  %v953_v56 = vsel %vm951_vm0, %v952_v52, %v950_v24 }
 0x1b4   : > { %v955_v5 = vmul.f32 %v1500_v51, %v860_v19 }
 0x1b6   : > { %v957_v54 = vsel %vm956_vm15, %v860_v19, %v955_v5 }
 0x1b7   : > { %v1502_v55 = vpop.eup %1501  ;;  %v960_v25 = vsel %vm958_vm1, %v959_v53, %v957_v54 }
 0x1b8   : > { %v1296_v58 = vpack.c.bf16 %v960_v25, %v953_v56  ;;  %v962_v59 = vmul.f32 %v1502_v55, %v861_v30 }
 0x1ba   : > { %1297 = vmatprep.subr.bf16.mxu1 %v1296_v58  ;;  %v964_v60 = vsel %vm963_vm2, %v861_v30, %v962_v59 }
 0x1bb   : > { %v1504_v32 = vpop.eup %1503  ;;  %1299 = vmatpush3.bf16.xpose.msra.mxu1 %v1296_v58  ;;  %v967_v33 = vsel %vm965_vm4, %v966_v26, %v964_v60 }
 0x1bc   : > { %v969_v61 = vmul.f32 %v1504_v32, %v862_v43 }
 0x1be   : > { %v971_v1 = vsel %vm970_vm3, %v862_v43, %v969_v61 }
 0x1bf   : > { %v974_v2 = vsel %vm972_vm5, %v973_v62, %v971_v1 }
 0x1c0   : > { %v1300_v3 = vpack.c.bf16 %v974_v2, %v967_v33 }
 0x1c2   : > { %1301 = vmatprep.subr.bf16.mxu1 %v1300_v3 }
 0x1c3   : > { %1303 = vmatpush3.bf16.xpose.msra.mxu1 %v1300_v3 }
 0x1ca   : > { %1238 = vmatmul.mubr.f32.vlgmr.msra.gmra.mrb[0].mxu1 %v976_v6 }
 0x29d   : > { %v1239_v7 = vpop.f32.mrb[0].mxu1 }
 0x29e   : > { %v1053_v8 = vmax.f32 %v1239_v7, 1e-05  ;;  %v1043_v9 = vpop.f32.mrb[1].mxu1 }
 0x29f   : > { %v1052_v35 = vmax.f32 %v1043_v9, 1e-05 }
 0x2a0   : > { %1505 = vlog2.f32 %v1053_v8 }
 0x2a1   : > { %1507 = vlog2.f32 %v1052_v35 }
 0x2aa   : > { %v1506_v10 = vpop.eup %1505 }
 0x2ab   : > { %v1508_v46 = vpop.eup %1507  ;;  %v1057_v11 = vmul.f32 0.6931472, %v1506_v10 }
 0x2ac   : > { %v1055_v12 = vmul.f32 0.6931472, %v1508_v46 }
 0x2ad   : > { %1059 = vst [vmem:[%s260_s30 + $0x8] sm:$0xff] %v1057_v11 }
 0x2ae   : > { %1058 = vst [vmem:[%s260_s30] sm:$0xff] %v1055_v12 }
 0x2af   : > { %1522 = shalt.err (!%p1519_p5)
}
 0x2b0   : > { %s1523_s11 = scalar_lea.hbm %s2137_s12, 256  ;;  %s1527_s22 = scalar_lea.hbm %s2189_s4, 512 }
 0x2b1   : > { %p1524_p6 = scmp.ne.s32.totalorder %s2137_s12, %s1523_s11  ;;  %p1528_p10 = scmp.lt.u32.totalorder %s2137_s12, %s2189_s4 }
 0x2b2   : > { %p1529_p11 = scmp.lt.u32.totalorder %s1527_s22, %s1523_s11  ;;  %p1531_p13 = scmp.lt.u32.totalorder %s1523_s11, %s2137_s12 }
 0x2b3   : > { %p1525_p7 = pnand %p1524_p6, %p1661_p4 }
 0x2b4   : > { %p1530_p12 = por %p1529_p11, %p1528_p10 }
 0x2b5   : > { %p1526_p9 = pneg %p1525_p7 }
 0x2b6   : > { %p1532_p0 = por %p1531_p13, %p1530_p12 }
 0x2b8   : > { %p1533_p1 = pnand %p1532_p0, %p1526_p9 }
 0x2ba   : > { %1536 = shalt.err (!%p1533_p1)
}
 0x2bb   : > { %s1594_s30 = smov 128   ;;  %s1595_s6 = smov 8  }
 0x2bc   : > { %1306 = dma.vmem_to_hbm [thread:$0]  (%p1661_p4), %s2132_s5, 256, %s2137_s12, %s2139_s13, %s1594_s30, %s1594_s30, %s1595_s6  }
 0x2bd PF: > { %p1313_p2 = scmp.ge.s32.totalorder %s1587_s20, 2  ;;  %s1090_s7 = sand.u32 1, %s1567_s15  }
 0x2be   : > { %s1091_s10 = scalar_lea.sflag [#allocation3], %s1090_s7 }
 0x2bf   : > { %p1309_p3 = pnand %p1313_p2, %p1668_p8 }
 0x2c1   : > { %1562 = dma.done.wait (!%p1309_p3), %s1091_s10, 256  }
 0x2c2   : > { %1564 = vsyncadd (!%p1309_p3), %s1091_s10, 4294967040  ;;  %s17_s20 = sadd.s32 1, %s1587_s20   ;;  %s2192_s15 = smov %s1571_s16 }
 0x2c3   : > { %p14_p5 = scmp.ge.s32.totalorder %s17_s20, 4   ;;  %s2193_s16 = smov %s1575_s17 }
 0x2c4   : > { %s2194_s17 = smov %s1674_s28  ;;  %s2195_s18 = smov %s1583_s19 }
 0x2c5   : > { %s2196_s19 = smov %s2198_s23  ;;  %16 = sbr.rel (!%p14_p5) target bundleno = 4 (0x4), region = 74 }
 0x2cc   :  { %1096 = vsyncpa [#allocation3], 1 }
 0x2cd   :  { %1098 = vsyncpa [#allocation3 + $0x1], 1 }

</bundles_post_ra>
